<compile_context>
chip_gen: v7x
topology: tpu7x:2x2x1
jax: 0.10.0
libtpu: 0.0.40
codegen_flags: <defaults>
</compile_context>

<pallas_src>
import jax
import jax.numpy as jnp
from jax.experimental import pallas as pl
from jax.experimental.pallas import tpu as pltpu


# --------------------------------------------------------------------------
# Kernels
# --------------------------------------------------------------------------
def _make_vmem_gather_kernel(tile_tokens: int, unroll: int):
    """Gather rows from a VMEM-resident table with vector row copies."""

    def kernel(ids_ref, table_ref, out_ref):
        # ids_ref:   (n_padded,) int32, SMEM (scalar prefetch)
        # table_ref: (vocab, embed_p) full table, resident in VMEM
        # out_ref:   (tile_tokens, embed_p) VMEM output block
        base = pl.program_id(0) * tile_tokens

        def copy_row(r, carry):
            tok = ids_ref[base + r]
            out_ref[pl.ds(r, 1), :] = table_ref[pl.ds(tok, 1), :]
            return carry

        jax.lax.fori_loop(0, tile_tokens, copy_row, 0, unroll=unroll)

    return kernel


def _make_hbm_gather_kernel(tile_tokens: int, n_inflight: int,
                            n_tokens: int, guard_tail: bool):
    """Gather rows from an HBM table with a deep in-flight row-DMA window."""
    assert tile_tokens % n_inflight == 0
    n_groups = tile_tokens // n_inflight

    def kernel(ids_ref, table_ref, out_ref, sem):
        # ids_ref:   (n_padded,) int32, SMEM (scalar prefetch)
        # table_ref: (vocab, embed_p) ref left in HBM (pl.ANY)
        # out_ref:   (tile_tokens, embed_p) VMEM output block
        # sem:       (n_inflight,) DMA semaphores
        base = pl.program_id(0) * tile_tokens

        def start_row(row, slot, tok):
            pltpu.make_async_copy(
                table_ref.at[pl.ds(tok, 1), :],
                out_ref.at[pl.ds(row, 1), :],
                sem.at[slot],
            ).start()

        def wait_slot(slot):
            # Size-matched dummy descriptor: .wait() only needs the semaphore
            # and the per-row byte count.
            # TODO(synk): fragile if Pallas ever validates src/dst of the
            # waited descriptor; a per-slot descriptor cache would fix it.
            pltpu.make_async_copy(
                table_ref.at[pl.ds(0, 1), :],
                out_ref.at[pl.ds(0, 1), :],
                sem.at[slot],
            ).wait()

        def issue(row, slot):
            tok = ids_ref[base + row]
            if guard_tail:
                @pl.when(base + row < n_tokens)
                def _():
                    start_row(row, slot, tok)
            else:
                start_row(row, slot, tok)

        def retire(row, slot):
            if guard_tail:
                @pl.when(base + row < n_tokens)
                def _():
                    wait_slot(slot)
            else:
                wait_slot(slot)

        # Prologue: fill the in-flight window (static unroll, static slots).
        for j in range(n_inflight):
            issue(j, j)

        # Steady state: one group of n_inflight rows per iteration; the inner
        # python loop is statically unrolled so the slot is a compile-time
        # constant, and the SMEM id read happens BEFORE the semaphore wait.
        if n_groups > 1:
            def group_body(g, carry):
                grp = g * n_inflight
                for j in range(n_inflight):
                    row = grp + j
                    prev_row = row - n_inflight       # row retired on slot j
                    tok = ids_ref[base + row]          # read id before wait
                    if guard_tail:
                        @pl.when(base + prev_row < n_tokens)
                        def _():
                            wait_slot(j)

                        @pl.when(base + row < n_tokens)
                        def _():
                            start_row(row, j, tok)
                    else:
                        wait_slot(j)
                        start_row(row, j, tok)
                return carry

            jax.lax.fori_loop(1, n_groups, group_body, 0)

        # Drain the final n_inflight copies (one per slot, in order).
        last = tile_tokens - n_inflight
        for j in range(n_inflight):
            retire(last + j, j)

    return kernel


# --------------------------------------------------------------------------
# Wrapper
# --------------------------------------------------------------------------
def _vmem_limit_bytes(resident_bytes: int) -> int:
    # Raise the scoped-VMEM limit just enough for what we allocate, with
    # headroom, clamped to values safe on every TPU generation (v7x has
    # 64 MiB physical per TensorCore).
    return int(min(max(resident_bytes + (8 << 20), 32 << 20), 48 << 20))


def token_embedding_lookup(token_ids, embedding_table, *,
                           tile_tokens=None,
                           n_inflight=32,
                           max_tile_bytes=4 << 20,
                           vmem_table_bytes=12 << 20,
                           force_hbm_gather=False):
    """Gather rows of `embedding_table` indexed by `token_ids`.

    token_ids:        integer array of any shape
    embedding_table:  (vocab_size, embed_dim)
    returns:          token_ids.shape + (embed_dim,), same dtype as the table
    """
    lead_shape = token_ids.shape
    vocab_size, embed_dim = embedding_table.shape
    n_tokens = 1
    for d in lead_shape:
        n_tokens *= int(d)

    if n_tokens == 0:
        return jnp.zeros(lead_shape + (embed_dim,), embedding_table.dtype)

    # Lane-dense output: pad embed_dim up to a multiple of 128 (sliced away
    # in the wrapper).  768 / 256 are already aligned -> no-op.
    embed_pad = (-embed_dim) % 128
    if embed_pad:
        embedding_table = jnp.pad(embedding_table, ((0, 0), (0, embed_pad)))
    embed_dim_p = embed_dim + embed_pad

    itemsize = jnp.dtype(embedding_table.dtype).itemsize
    row_bytes = embed_dim_p * itemsize

    # --- token tile size (multiple of 8 sublanes) ---------------------------
    need_rows = ((n_tokens + 7) // 8) * 8
    if tile_tokens is None:
        cap = max(8, (max_tile_bytes // row_bytes) // 8 * 8)
        cap = min(cap, 1024)
        tile_tokens = min(cap, need_rows)
        # Prefer >= 2 grid tiles when the token count permits: the grid axis
        # is "parallel", so v7x can shard tiles across its two TensorCores.
        if tile_tokens >= need_rows and need_rows >= 16:
            tile_tokens = max(8, ((need_rows // 2 + 7) // 8) * 8)
    assert tile_tokens % 8 == 0 and tile_tokens >= 8

    num_tiles = (n_tokens + tile_tokens - 1) // tile_tokens
    n_padded = num_tiles * tile_tokens
    guard_tail = n_padded != n_tokens

    # In-flight DMA window: clamp to a divisor of tile_tokens so the
    # steady-state loop groups evenly (tile_tokens is a multiple of 8, so
    # this always terminates at >= 8 for default settings).
    n_inflight = int(max(1, min(n_inflight, tile_tokens)))
    while tile_tokens % n_inflight != 0:
        n_inflight -= 1

    # --- token ids: clamp, flatten, pad ------------------------------------
    flat_ids = token_ids.reshape(n_tokens).astype(jnp.int32)
    # PyTorch errors on out-of-range ids; we clamp them instead.
    flat_ids = jnp.clip(flat_ids, 0, vocab_size - 1)
    if guard_tail:
        flat_ids = jnp.concatenate(
            [flat_ids, jnp.zeros((n_padded - n_tokens,), jnp.int32)])

    out_block_bytes = tile_tokens * row_bytes
    table_bytes = vocab_size * embed_dim_p * itemsize

    # --- choose gather path --------------------------------------------------
    use_vmem_table = (not force_hbm_gather
                      and table_bytes <= vmem_table_bytes
                      and 2 * table_bytes + 2 * out_block_bytes <= (28 << 20))

    out_spec = pl.BlockSpec((tile_tokens, embed_dim_p), lambda i, ids: (i, 0))

    if use_vmem_table:
        kernel = _make_vmem_gather_kernel(tile_tokens,
                                          unroll=min(8, tile_tokens))
        grid_spec = pltpu.PrefetchScalarGridSpec(
            num_scalar_prefetch=1,
            grid=(num_tiles,),
            in_specs=[pl.BlockSpec((vocab_size, embed_dim_p),
                                   lambda i, ids: (0, 0))],   # table in VMEM
            out_specs=out_spec,
        )
        resident = 2 * table_bytes + 2 * out_block_bytes
    else:
        kernel = _make_hbm_gather_kernel(tile_tokens, n_inflight,
                                         n_tokens, guard_tail)
        grid_spec = pltpu.PrefetchScalarGridSpec(
            num_scalar_prefetch=1,
            grid=(num_tiles,),
            in_specs=[pl.BlockSpec(memory_space=pl.ANY)],     # table in HBM
            out_specs=out_spec,
            scratch_shapes=[pltpu.SemaphoreType.DMA((n_inflight,))],
        )
        resident = 2 * out_block_bytes

    flat_out = pl.pallas_call(
        kernel,
        out_shape=jax.ShapeDtypeStruct((n_padded, embed_dim_p),
                                       embedding_table.dtype),
        grid_spec=grid_spec,
        compiler_params=pltpu.CompilerParams(
            dimension_semantics=("parallel",),
            vmem_limit_bytes=_vmem_limit_bytes(resident)),
    )(flat_ids, embedding_table)

    if guard_tail:
        flat_out = flat_out[:n_tokens]
    if embed_pad:
        flat_out = flat_out[:, :embed_dim]
    return flat_out.reshape(lead_shape + (embed_dim,))


class DummyTextEncoderPallas:
    """JAX/Pallas port of the PyTorch DummyTextEncoder (nn.Embedding only)."""

    def __init__(self, vocab_size=49408, embed_dim=768, key=None,
                 param_dtype=jnp.float32):
        if key is None:
            key = jax.random.PRNGKey(0)
        self.vocab_size = vocab_size
        self.embed_dim = embed_dim
        # nn.Embedding default init: N(0, 1).  param_dtype=jnp.bfloat16 is an
        # opt-in memory/bandwidth optimization (halves row bytes; makes large
        # tables VMEM-resident on v5e/v6e) that changes numerics vs the f32
        # PyTorch reference, so the default stays float32.
        self.token_embedding = jax.random.normal(
            key, (vocab_size, embed_dim)).astype(param_dtype)

    def __call__(self, x):
        return token_embedding_lookup(x, self.token_embedding)


if __name__ == "__main__":
    vocab_size = 1024
    embed_dim = 256

    key = jax.random.PRNGKey(0)
    k_w, k_x1, k_x2, k_x3, k_x4 = jax.random.split(key, 5)

    encoder = DummyTextEncoderPallas(vocab_size=vocab_size,
                                     embed_dim=embed_dim, key=k_w)
    table = encoder.token_embedding

    # Case 1: (2, 8) = 16 tokens. VMEM-resident-table fast path, 2 tiles.
    x1 = jax.random.randint(k_x1, (2, 8), 0, vocab_size, dtype=jnp.int32)
    out1 = jax.block_until_ready(encoder(x1))
    ref1 = table[x1]
    assert out1.shape == (2, 8, embed_dim)
    assert out1.dtype == jnp.float32
    assert jnp.array_equal(out1, ref1), "Pallas embedding mismatch (case 1)"

    # Case 2: (3, 5) = 15 tokens. VMEM path with a padded tail tile.
    x2 = jax.random.randint(k_x2, (3, 5), 0, vocab_size, dtype=jnp.int32)
    out2 = jax.block_until_ready(encoder(x2))
    assert out2.shape == (3, 5, embed_dim)
    assert jnp.array_equal(out2, table[x2]), "Pallas embedding mismatch (case 2)"

    # Case 3: force the HBM manual-DMA gather path (used for large tables),
    # including the tail-guarded prologue/drain.
    x3 = jax.random.randint(k_x3, (3, 5), 0, vocab_size, dtype=jnp.int32)
    out3 = jax.block_until_ready(
        token_embedding_lookup(x3, table, force_hbm_gather=True))
    assert jnp.array_equal(out3, table[x3]), "Pallas embedding mismatch (case 3)"

    # Case 4: HBM path with a multi-group steady-state loop
    # (80 tokens, tile=32, 8-deep in-flight window, guarded tail tile).
    x4 = jax.random.randint(k_x4, (4, 20), 0, vocab_size, dtype=jnp.int32)
    out4 = jax.block_until_ready(
        token_embedding_lookup(x4, table, tile_tokens=32, n_inflight=8,
                               force_hbm_gather=True))
    assert out4.shape == (4, 20, embed_dim)
    assert jnp.array_equal(out4, table[x4]), "Pallas embedding mismatch (case 4)"

    print("KERNEL_OK")
</pallas_src>

<mosaic_0001>
module attributes {stable_mosaic.version = 11 : i64} {
  func.func @kernel(%arg0: i32, %arg1: memref<16xi32, #tpu.memory_space<smem>>, %arg2: memref<1024x256xf32, #tpu.memory_space<vmem>>, %arg3: memref<8x256xf32, #tpu.memory_space<vmem>>) attributes {dimension_semantics = [#tpu.dimension_semantics<parallel>], iteration_bounds = array<i64: 2>, scalar_prefetch = 1 : i64, scratch_operands = 0 : i64, tpu.core_type = #tpu.core_type<tc>, window_params = [{pipeline_mode = #tpu.pipeline_mode<synchronous>, transform_indices = @transform_0, window_bounds = array<i64: 1024, 256>}, {transform_indices = @transform_1, window_bounds = array<i64: 8, 256>}]} {
    %c8_i32 = arith.constant 8 : i32
    %0 = arith.muli %arg0, %c8_i32 : i32
    %c0_i32 = arith.constant 0 : i32
    %1 = arith.addi %0, %c0_i32 : i32
    %2 = arith.index_cast %1 : i32 to index
    %3 = memref.load %arg1[%2] : memref<16xi32, #tpu.memory_space<smem>>
    %4 = arith.index_cast %3 : i32 to index
    %c0 = arith.constant 0 : index
    %5 = vector.load %arg2[%4, %c0] : memref<1024x256xf32, #tpu.memory_space<vmem>>, vector<1x256xf32>
    %6 = arith.index_cast %c0_i32 : i32 to index
    %c0_0 = arith.constant 0 : index
    %7 = vector.load %arg3[%6, %c0_0] : memref<8x256xf32, #tpu.memory_space<vmem>>, vector<1x256xf32>
    tpu.vector_store %arg3[%6, %c0_0], %5 {strides = array<i32>} : memref<8x256xf32, #tpu.memory_space<vmem>>, vector<1x256xf32>,
    %c1_i32 = arith.constant 1 : i32
    %8 = arith.addi %0, %c1_i32 : i32
    %9 = arith.index_cast %8 : i32 to index
    %10 = memref.load %arg1[%9] : memref<16xi32, #tpu.memory_space<smem>>
    %11 = arith.index_cast %10 : i32 to index
    %c0_1 = arith.constant 0 : index
    %12 = vector.load %arg2[%11, %c0_1] : memref<1024x256xf32, #tpu.memory_space<vmem>>, vector<1x256xf32>
    %13 = arith.index_cast %c1_i32 : i32 to index
    %c0_2 = arith.constant 0 : index
    %14 = vector.load %arg3[%13, %c0_2] : memref<8x256xf32, #tpu.memory_space<vmem>>, vector<1x256xf32>
    tpu.vector_store %arg3[%13, %c0_2], %12 {strides = array<i32>} : memref<8x256xf32, #tpu.memory_space<vmem>>, vector<1x256xf32>,
    %c2_i32 = arith.constant 2 : i32
    %15 = arith.addi %0, %c2_i32 : i32
    %16 = arith.index_cast %15 : i32 to index
    %17 = memref.load %arg1[%16] : memref<16xi32, #tpu.memory_space<smem>>
    %18 = arith.index_cast %17 : i32 to index
    %c0_3 = arith.constant 0 : index
    %19 = vector.load %arg2[%18, %c0_3] : memref<1024x256xf32, #tpu.memory_space<vmem>>, vector<1x256xf32>
    %20 = arith.index_cast %c2_i32 : i32 to index
    %c0_4 = arith.constant 0 : index
    %21 = vector.load %arg3[%20, %c0_4] : memref<8x256xf32, #tpu.memory_space<vmem>>, vector<1x256xf32>
    tpu.vector_store %arg3[%20, %c0_4], %19 {strides = array<i32>} : memref<8x256xf32, #tpu.memory_space<vmem>>, vector<1x256xf32>,
    %c3_i32 = arith.constant 3 : i32
    %22 = arith.addi %0, %c3_i32 : i32
    %23 = arith.index_cast %22 : i32 to index
    %24 = memref.load %arg1[%23] : memref<16xi32, #tpu.memory_space<smem>>
    %25 = arith.index_cast %24 : i32 to index
    %c0_5 = arith.constant 0 : index
    %26 = vector.load %arg2[%25, %c0_5] : memref<1024x256xf32, #tpu.memory_space<vmem>>, vector<1x256xf32>
    %27 = arith.index_cast %c3_i32 : i32 to index
    %c0_6 = arith.constant 0 : index
    %28 = vector.load %arg3[%27, %c0_6] : memref<8x256xf32, #tpu.memory_space<vmem>>, vector<1x256xf32>
    tpu.vector_store %arg3[%27, %c0_6], %26 {strides = array<i32>} : memref<8x256xf32, #tpu.memory_space<vmem>>, vector<1x256xf32>,
    %c4_i32 = arith.constant 4 : i32
    %29 = arith.addi %0, %c4_i32 : i32
    %30 = arith.index_cast %29 : i32 to index
    %31 = memref.load %arg1[%30] : memref<16xi32, #tpu.memory_space<smem>>
    %32 = arith.index_cast %31 : i32 to index
    %c0_7 = arith.constant 0 : index
    %33 = vector.load %arg2[%32, %c0_7] : memref<1024x256xf32, #tpu.memory_space<vmem>>, vector<1x256xf32>
    %34 = arith.index_cast %c4_i32 : i32 to index
    %c0_8 = arith.constant 0 : index
    %35 = vector.load %arg3[%34, %c0_8] : memref<8x256xf32, #tpu.memory_space<vmem>>, vector<1x256xf32>
    tpu.vector_store %arg3[%34, %c0_8], %33 {strides = array<i32>} : memref<8x256xf32, #tpu.memory_space<vmem>>, vector<1x256xf32>,
    %c5_i32 = arith.constant 5 : i32
    %36 = arith.addi %0, %c5_i32 : i32
    %37 = arith.index_cast %36 : i32 to index
    %38 = memref.load %arg1[%37] : memref<16xi32, #tpu.memory_space<smem>>
    %39 = arith.index_cast %38 : i32 to index
    %c0_9 = arith.constant 0 : index
    %40 = vector.load %arg2[%39, %c0_9] : memref<1024x256xf32, #tpu.memory_space<vmem>>, vector<1x256xf32>
    %41 = arith.index_cast %c5_i32 : i32 to index
    %c0_10 = arith.constant 0 : index
    %42 = vector.load %arg3[%41, %c0_10] : memref<8x256xf32, #tpu.memory_space<vmem>>, vector<1x256xf32>
    tpu.vector_store %arg3[%41, %c0_10], %40 {strides = array<i32>} : memref<8x256xf32, #tpu.memory_space<vmem>>, vector<1x256xf32>,
    %c6_i32 = arith.constant 6 : i32
    %43 = arith.addi %0, %c6_i32 : i32
    %44 = arith.index_cast %43 : i32 to index
    %45 = memref.load %arg1[%44] : memref<16xi32, #tpu.memory_space<smem>>
    %46 = arith.index_cast %45 : i32 to index
    %c0_11 = arith.constant 0 : index
    %47 = vector.load %arg2[%46, %c0_11] : memref<1024x256xf32, #tpu.memory_space<vmem>>, vector<1x256xf32>
    %48 = arith.index_cast %c6_i32 : i32 to index
    %c0_12 = arith.constant 0 : index
    %49 = vector.load %arg3[%48, %c0_12] : memref<8x256xf32, #tpu.memory_space<vmem>>, vector<1x256xf32>
    tpu.vector_store %arg3[%48, %c0_12], %47 {strides = array<i32>} : memref<8x256xf32, #tpu.memory_space<vmem>>, vector<1x256xf32>,
    %c7_i32 = arith.constant 7 : i32
    %50 = arith.addi %0, %c7_i32 : i32
    %51 = arith.index_cast %50 : i32 to index
    %52 = memref.load %arg1[%51] : memref<16xi32, #tpu.memory_space<smem>>
    %53 = arith.index_cast %52 : i32 to index
    %c0_13 = arith.constant 0 : index
    %54 = vector.load %arg2[%53, %c0_13] : memref<1024x256xf32, #tpu.memory_space<vmem>>, vector<1x256xf32>
    %55 = arith.index_cast %c7_i32 : i32 to index
    %c0_14 = arith.constant 0 : index
    %56 = vector.load %arg3[%55, %c0_14] : memref<8x256xf32, #tpu.memory_space<vmem>>, vector<1x256xf32>
    tpu.vector_store %arg3[%55, %c0_14], %54 {strides = array<i32>} : memref<8x256xf32, #tpu.memory_space<vmem>>, vector<1x256xf32>,
    %c8_i32_15 = arith.constant 8 : i32
    return
  }
  func.func @transform_0(%arg0: i32, %arg1: memref<16xi32, #tpu.memory_space<smem>>) -> (i32, i32) {
    %c0_i32 = arith.constant 0 : i32
    %c0_i32_0 = arith.constant 0 : i32
    %c0_i32_1 = arith.constant 0 : i32
    return %c0_i32, %c0_i32_0 : i32, i32
  }
  func.func @transform_1(%arg0: i32, %arg1: memref<16xi32, #tpu.memory_space<smem>>) -> (i32, i32) {
    %c0_i32 = arith.constant 0 : i32
    %c0_i32_0 = arith.constant 0 : i32
    return %arg0, %c0_i32 : i32, i32
  }
}

</mosaic_0001>

<bundles_post_ra>
// kernel: tpu_custom_call.1
= control target key start
LH: loop header
LB: loop body
LE: loop exit
PB: predicated region body
PF: predicated region fallthrough
CT: control target
= control target key end

     0   :  { %s757_s0 = inlined_call_operand.hbm [shape: s32[16], index: 0, kind: input, shape index: {}]   ;;  %s758_s1 = inlined_call_operand.hbm [shape: f32[1024,256], index: 1, kind: input, shape index: {}]   ;;  %s759_s2 = inlined_call_operand.hbm [shape: f32[16,256], index: 2, kind: output, shape index: {}]  }
   0x1   :  { %s425_s11 = scalar_lea.hbm %s757_s0, 16 }
   0x2   :  { %p426_p0 = scmp.ne.s32.totalorder %s757_s0, %s425_s11  ;;  %p429_p1 = scmp.lt.u32.totalorder %s425_s11, %s757_s0 }
   0x4   :  { %p431_p2 = pnand %p429_p1, %p426_p0 }
   0x6   :  { %434 = shalt.err (!%p431_p2)  }
   0x7   :  { %s533_s16 = smov [#allocation3]  }
   0x8   :  { %8 = dma.hbm_to_smem %s757_s0, 16, %s533_s16, [#allocation2] }
   0x9   :  { %507 = dma.done.wait [#allocation2], 16 }
   0xa   :  { %508 = vsyncadd [#allocation2], 4294967280 }
   0xb   :  { %10 = sfence }
   0xc   :  { %11 = vsyncpa [#allocation5], 0 }
   0xd   :  { %12 = vsyncpa [#allocation6], 0 }
   0xe   :  { %14 = vsyncpa [#allocation6 + $0x1], 0  ;;  %s565_s19 = smov 0   ;;  %s567_s20 = smov 0  }
   0xf   :  { %s569_s21 = smov 0   ;;  %s571_s22 = smov 0  }
  0x10 LB: > { %s586_s0 = sadd.s32 4294967295, %s531_s22   ;;  %s328_s23 = sadd.s32 4294967294, %s531_s22   ;;  %s531_s22 = sphi %s571_s22, %s777_s22   ;;  %s527_s21 = sphi %s569_s21, %s776_s21   ;;  %s523_s20 = sphi %s567_s20, %s775_s20   ;;  %s519_s19 = sphi %s565_s19, %s774_s19  }
  0x11   : > { %s590_s24 = sadd.s32 1, %s531_s22   ;;  %s48_s25 = sadd.s32 1, %s527_s21 }
  0x12   : > { %s45_s26 = ssub.s32 %s531_s22, %s590_s24  ;;  %p58_p3 = scmp.ne.s32.totalorder %s527_s21, %s523_s20 }
  0x13   : > { %p46_p4 = scmp.eq.s32.totalorder %s45_s26, 0  ;;  %p59_p5 = scmp.eq.s32.totalorder %s586_s0, 1 }
  0x14   : > { %p64_p6 = scmp.ne.s32.totalorder %s523_s20, %s519_s19  ;;  %p65_p7 = scmp.eq.s32.totalorder %s328_s23, 1 }
  0x15   : > { %s601_s27 = scalar_select %p46_p4, %s527_s21, %s48_s25  }
  0x16   : > { %p603_p8 = por %p59_p5, %p58_p3  ;;  %p607_p9 = por %p65_p7, %p64_p6 }
  0x17   : > { %p329_p10 = scmp.ge.s32.totalorder %s531_s22, 1  ;;  %p72_p11 = scmp.lt.s32.totalorder %s531_s22, 3 }
  0x18   : > { %s763_s28 = scalar_select %p603_p8, 1, 0 }
  0x19   : > { %s764_s29 = scalar_select %p607_p9, 1, 0 }
  0x1a   : > { %p760_p12 = scmp.eq.s32.totalorder %s586_s0, 0  ;;  %p614_p13 = pnand %p329_p10, %p72_p11 }
  0x1b   : > { %s534_s3 = smov [#allocation4]   ;;  %s435_s8 = scalar_lea.hbm %s758_s1, 32768 }
  0x1c   : > { %s765_s30 = scalar_select %p614_p13, 1, 0 }
  0x1d   : > { %s84_s4 = sshll.u32 %s534_s3, 4  ;;  %p378_p0 = pneg %p614_p13  ;;  %s85_s4 = int_to_ptr.vmem [resolvable:$true] %s84_s4 }
  0x1e   : > { %p436_p2 = scmp.ne.s32.totalorder %s758_s1, %s435_s8  ;;  %p442_p6 = scmp.lt.u32.totalorder %s435_s8, %s758_s1 }
  0x1f   : > { %p622_p1 = pnand %p760_p12, %p378_p0 }
  0x21   : > { %p437_p3 = pneg %p622_p1 }
  0x23   : > { %p438_p4 = pnand %p437_p3, %p436_p2 }
  0x25   : > { %p439_p5 = pneg %p438_p4 }
  0x27   : > { %p444_p7 = pnand %p442_p6, %p439_p5 }
  0x29   : > { %447 = shalt.err (!%p444_p7)
}
  0x2a   : > { %s448_s13 = scalar_lea.vmem %s85_s4, 32768  ;;  %p456_p12 = scmp.lt.s32.totalorder %s85_s4, %s85_s4 }
  0x2b   : > { %p449_p10 = scmp.ne.s32.totalorder %s85_s4, %s448_s13  ;;  %p457_p9 = scmp.lt.s32.totalorder %s448_s13, %s448_s13 }
  0x2d   : > { %p451_p11 = pnand %p449_p10, %p437_p3  ;;  %p458_p8 = por %p457_p9, %p456_p12 }
  0x2f   : > { %p452_p0 = pneg %p451_p11 }
  0x31   : > { %p459_p13 = pnand %p458_p8, %p452_p0 }
  0x33   : > { %462 = shalt.err (!%p459_p13)
}
  0x34   : > { %s535_s14 = smov 256   ;;  %s536_s15 = smov 16  }
  0x35   : > { %381 = dma.hbm_to_vmem [thread:$0]  (!%p622_p1), %s758_s1, 32768, %s85_s4, [#allocation5], %s535_s14, %s535_s14, %s536_s15  }
  0x36   : > { %p767_p2 = scmp.ne.s32.totalorder %s765_s30, 0 }
  0x37   : > { %p768_p4 = scmp.eq.s32.totalorder (!%p767_p2), %s586_s0, 0 }
  0x38   : > { %100 = sbr.rel (%p767_p2) target bundleno = 120 (0x78), region = 24 }
  0x3f   : > { %510 = dma.done.wait (%p768_p4), [#allocation5], 32768   ;;  %p769_p3 = pmov %p768_p4 }
  0x40   : > { %s112_s18 = sand.u32 1, %s523_s20   ;;  %s650_s23 = sshll.u32 %s586_s0, 3  ;;  %v126_v0 = vlaneseq }
  0x41   : > { %512 = vsyncadd (%p769_p3), [#allocation5], 4294934528  ;;  %s333_s25 = sshll.u32 %s112_s18, 4  ;;  %s116_s26 = sld [smem:[#allocation3 + %s650_s23]] }
  0x42   : > { %s132_s30 = sadd.s32 1, %s650_s23  ;;  %s146_s3 = sadd.s32 2, %s650_s23  ;;  %vm666_vm0 = vcmp.lt.s32.totalorder %v126_v0, 256 }
  0x43   : > { %s133_s4 = sld [smem:[#allocation3 + %s132_s30]]  ;;  %s160_s6 = sadd.s32 3, %s650_s23 }
  0x44   : > { %s657_s5 = sld [smem:[#allocation3 + %s146_s3]]  ;;  %s174_s7 = sadd.s32 4, %s650_s23 }
  0x45   : > { %s661_s8 = sld [smem:[#allocation3 + %s160_s6]]  ;;  %s188_s13 = sadd.s32 5, %s650_s23 }
  0x46   : > { %s663_s9 = sld [smem:[#allocation3 + %s174_s7]]  ;;  %s672_s6 = scalar_lea.vmem [#allocation7], %s333_s25 }
  0x47   : > { %s117_s10 = sshra.s32 %s116_s26, 3  ;;  %s120_s11 = sand.u32 7, %s116_s26 }
  0x48   : > { %s363_s12 = sshll.u32 %s117_s10, 4  ;;  %s670_s15 = sld [smem:[#allocation3 + %s188_s13]] }
  0x49   : > { %s123_s14 = sadd.s32 %s363_s12, %s120_s11  ;;  %s134_s16 = sshra.s32 %s133_s4, 3 }
  0x4a   : > { %s124_s17 = scalar_lea.vmem [#allocation4], %s123_s14  ;;  %s137_s30 = sand.u32 7, %s133_s4 }
  0x4b   : > { %v125_v2 = vld [vmem:[%s124_s17] ss:$8 sm:$0x3]  ;;  %s364_s3 = sshll.u32 %s134_s16, 4  ;;  %s148_s7 = sshra.s32 %s657_s5, 3 }
  0x4c   : > { %130 = vst.msk [vmem:[%s672_s6] ss:$8 sm:$0x3] %vm666_vm0, %v125_v2  ;;  %s140_s26 = sadd.s32 %s364_s3, %s137_s30  ;;  %s151_s10 = sand.u32 7, %s657_s5 }
  0x4d   : > { %s141_s11 = scalar_lea.vmem [#allocation4], %s140_s26  ;;  %s365_s12 = sshll.u32 %s148_s7, 4 }
  0x4e   : > { %v142_v3 = vld [vmem:[%s141_s11] ss:$8 sm:$0x3]  ;;  %s162_s4 = sshra.s32 %s661_s8, 3  ;;  %s154_s25 = sadd.s32 %s365_s12, %s151_s10 }
  0x4f   : > { %339 = vst.msk [vmem:[%s672_s6 + $0x1] ss:$8 sm:$0x3] %vm666_vm0, %v142_v3  ;;  %s165_s13 = sand.u32 7, %s661_s8  ;;  %s366_s14 = sshll.u32 %s162_s4, 4 }
  0x50   : > { %s155_s16 = scalar_lea.vmem [#allocation4], %s154_s25  ;;  %s168_s17 = sadd.s32 %s366_s14, %s165_s13 }
  0x51   : > { %v156_v4 = vld [vmem:[%s155_s16] ss:$8 sm:$0x3]  ;;  %s176_s30 = sshra.s32 %s663_s9, 3  ;;  %s179_s5 = sand.u32 7, %s663_s9 }
  0x52   : > { %342 = vst.msk [vmem:[%s672_s6 + $0x2] ss:$8 sm:$0x3] %vm666_vm0, %v156_v4  ;;  %s169_s3 = scalar_lea.vmem [#allocation4], %s168_s17  ;;  %s367_s26 = sshll.u32 %s176_s30, 4 }
  0x53   : > { %v170_v5 = vld [vmem:[%s169_s3] ss:$8 sm:$0x3]  ;;  %s190_s7 = sshra.s32 %s670_s15, 3  ;;  %s182_s8 = sadd.s32 %s367_s26, %s179_s5 }
  0x54   : > { %345 = vst.msk [vmem:[%s672_s6 + $0x3] ss:$8 sm:$0x3] %vm666_vm0, %v170_v5  ;;  %s193_s10 = sand.u32 7, %s670_s15  ;;  %s368_s11 = sshll.u32 %s190_s7, 4 }
  0x55   : > { %s183_s12 = scalar_lea.vmem [#allocation4], %s182_s8  ;;  %s196_s4 = sadd.s32 %s368_s11, %s193_s10 }
  0x56   : > { %v184_v6 = vld [vmem:[%s183_s12] ss:$8 sm:$0x3]  ;;  %s202_s25 = sadd.s32 6, %s650_s23  ;;  %s197_s13 = scalar_lea.vmem [#allocation4], %s196_s4 }
  0x57   : > { %348 = vst.msk [vmem:[%s672_s6 + $0x4] ss:$8 sm:$0x3] %vm666_vm0, %v184_v6  ;;  %s203_s9 = sld [smem:[#allocation3 + %s202_s25]]  ;;  %s216_s14 = sadd.s32 7, %s650_s23 }
  0x58   : > { %v198_v7 = vld [vmem:[%s197_s13] ss:$8 sm:$0x3]  ;;  %s217_s16 = sld [smem:[#allocation3 + %s216_s14]]  ;;  %s371_s17 = sshll.u32 %s586_s0, 8 }
  0x59   : > { %351 = vst.msk [vmem:[%s672_s6 + $0x5] ss:$8 sm:$0x3] %vm666_vm0, %v198_v7  ;;  %s245_s3 = sshll.u32 %s672_s6, 4  ;;  %s710_s0 = scalar_lea.hbm %s759_s2, %s371_s17  ;;  %s712_s3 = int_to_ptr.vmem [resolvable:$true] %s245_s3 }
  0x5a   : > { %s463_s13 = scalar_lea.vmem %s712_s3, 256  ;;  %p772_p9 = scmp.ne.s32.totalorder %s763_s28, 0 }
  0x5b   : > { %p464_p8 = scmp.ne.s32.totalorder %s712_s3, %s463_s13  ;;  %s537_s14 = smov [#allocation7]  }
  0x5d   : > { %s204_s15 = sshra.s32 %s203_s9, 3  ;;  %s207_s30 = sand.u32 7, %s203_s9 }
  0x5e   : > { %s369_s5 = sshll.u32 %s204_s15, 4  ;;  %s218_s7 = sshra.s32 %s217_s16, 3 }
  0x5f   : > { %s210_s26 = sadd.s32 %s369_s5, %s207_s30  ;;  %s221_s8 = sand.u32 7, %s217_s16 }
  0x60   : > { %s211_s10 = scalar_lea.vmem [#allocation4], %s210_s26  ;;  %s370_s11 = sshll.u32 %s218_s7, 4 }
  0x61   : > { %v212_v8 = vld [vmem:[%s211_s10] ss:$8 sm:$0x3]  ;;  %s224_s23 = sadd.s32 %s370_s11, %s221_s8  ;;  %s231_s9 = scalar_lea.sflag [#allocation6], %s112_s18 }
  0x62   : > { %354 = vst.msk [vmem:[%s672_s6 + $0x6] ss:$8 sm:$0x3] %vm666_vm0, %v212_v8  ;;  %s225_s25 = scalar_lea.vmem [#allocation4], %s224_s23  ;;  %p465_p12 = pnand %p464_p8, %p772_p9 }
  0x63   : > { %v226_v9 = vld [vmem:[%s225_s25] ss:$8 sm:$0x3]  ;;  %s467_s16 = sshll.u32 %s537_s14, 4  ;;  %s468_s16 = int_to_ptr.vmem [resolvable:$false] %s467_s16 }
  0x64   : > { %357 = vst.msk [vmem:[%s672_s6 + $0x7] ss:$8 sm:$0x3] %vm666_vm0, %v226_v9  ;;  %p466_p13 = pneg %p465_p12  ;;  %s469_s17 = scalar_lea.vmem %s468_s16, 512 }
  0x65   : > { %p470_p1 = scmp.lt.s32.totalorder %s712_s3, %s468_s16  ;;  %p471_p5 = scmp.lt.s32.totalorder %s469_s17, %s463_s13 }
  0x67   : > { %p472_p6 = por %p471_p5, %p470_p1 }
  0x69   : > { %p473_p7 = pnand %p472_p6, %p466_p13 }
  0x6b   : > { %476 = shalt.err (!%p473_p7)
}
  0x6c   : > { %s477_s18 = scalar_lea.hbm %s710_s0, 256  ;;  %s481_s30 = scalar_lea.hbm %s759_s2, 512 }
  0x6d   : > { %p478_p10 = scmp.ne.s32.totalorder %s710_s0, %s477_s18  ;;  %p482_p2 = scmp.lt.u32.totalorder %s710_s0, %s759_s2 }
  0x6e   : > { %p483_p4 = scmp.lt.u32.totalorder %s481_s30, %s477_s18  ;;  %p485_p8 = scmp.lt.u32.totalorder %s477_s18, %s710_s0 }
  0x6f   : > { %p479_p11 = pnand %p478_p10, %p772_p9 }
  0x70   : > { %p484_p3 = por %p483_p4, %p482_p2 }
  0x71   : > { %p480_p0 = pneg %p479_p11 }
  0x72   : > { %p486_p12 = por %p485_p8, %p484_p3 }
  0x74   : > { %p487_p13 = pnand %p486_p12, %p480_p0 }
  0x76   : > { %490 = shalt.err (!%p487_p13)
}
  0x77   : > { %376 = dma.vmem_to_hbm [thread:$0]  (%p772_p9), %s712_s3, 256, %s710_s0, %s231_s9  }
  0x78 PF: > { %p388_p1 = scmp.ge.s32.totalorder %s531_s22, 2  ;;  %s257_s7 = sand.u32 1, %s519_s19  }
  0x79   : > { %p773_p5 = scmp.ne.s32.totalorder %s764_s29, 0  ;;  %s258_s8 = scalar_lea.sflag [#allocation6], %s257_s7 }
  0x7b   : > { %p383_p6 = pnand %p388_p1, %p773_p5 }
  0x7d   : > { %514 = dma.done.wait (!%p383_p6), %s258_s8, 256  }
  0x7e   : > { %516 = vsyncadd (!%p383_p6), %s258_s8, 4294967040  ;;  %p17_p7 = scmp.ge.s32.totalorder %s590_s24, 4   ;;  %s774_s19 = smov %s523_s20 }
  0x7f   : > { %s775_s20 = smov %s527_s21  ;;  %s776_s21 = smov %s601_s27 }
  0x80   : > { %s777_s22 = smov %s590_s24  ;;  %19 = sbr.rel (!%p17_p7) target bundleno = 16 (0x10), region = 76 }
  0x87   :  { %263 = vsyncpa [#allocation5], 1 }
  0x88   :  { %265 = vsyncpa [#allocation5 + $0x1], 1 }
  0x89   :  { %266 = vsyncpa [#allocation6], 1 }
  0x8a   :  { %268 = vsyncpa [#allocation6 + $0x1], 1 }

</bundles_post_ra>
